<compile_context>
chip_gen: v5e
topology: v5e:2x2
jax: 0.10.0
libtpu: 0.0.40
codegen_flags: <defaults>
</compile_context>

<pallas_src>
import jax
import jax.numpy as jnp
from jax import lax
from jax.experimental import pallas as pl
from jax.experimental.pallas import tpu as pltpu


def _round_up(x, m):
    return ((x + m - 1) // m) * m


def cbar_kernel(edges_ref, out_ref):
    # edges_ref: (2, te) int32 — row 0: target vertex ids, row 1: bitcast c_ij.
    # out_ref:   (q_dim, 128) f32 — this vertex tile's accumulator, resident
    #            across the edge grid axis; out_ref[q, p] == cbar[base+128*q+p].
    q_dim = out_ref.shape[0]

    @pl.when(pl.program_id(1) == 0)
    def _init():
        out_ref[...] = jnp.zeros_like(out_ref)

    tgt = edges_ref[0:1, :]                                     # (1, te) i32
    c = pltpu.bitcast(edges_ref[1:2, :], jnp.float32)           # (1, te) f32

    # Low 7 bits of the target id -> lane p of the accumulator (128 = 2**7).
    p_ids = lax.broadcasted_iota(jnp.int32, (128, 1), 0)        # (128, 1)
    p_mat = jnp.where((tgt & 127) == p_ids, c, 0.0)             # (128, te) f32

    # High bits -> sublane row q of this vertex tile's accumulator.
    # (Sentinel target -1: (-1 >> 7) == -1 never matches a q id, so padded
    #  edges contribute nothing; out-of-tile edges are gated the same way.)
    hi_base = pl.program_id(0) * q_dim
    q_ids = hi_base + lax.broadcasted_iota(jnp.int32, (q_dim, 1), 0)
    q_mat = ((tgt >> 7) == q_ids).astype(jnp.float32)           # (q_dim, te)

    # out[q, p] += sum_e q_mat[q, e] * p_mat[p, e]  — MXU, contract last dims.
    out_ref[...] += lax.dot_general(
        q_mat, p_mat,
        dimension_numbers=(((1,), (1,)), ((), ())),
        preferred_element_type=jnp.float32,
        precision=lax.Precision.HIGHEST,
    )


def vertex_update(vertex_attr, edgeij_pair, edge_attr, *, tv=8192, te=2048):
    """vertex_attr: (V, 2) f32, edgeij_pair: (2, E) int, edge_attr: (E, >=2) f32."""
    V = vertex_attr.shape[0]
    E = edge_attr.shape[0]

    # Vertex tile: multiple of 1024 so q_dim = tv // 128 is a multiple of 8
    # (aligned sublane dim for accumulator / MXU lhs).  n_vt == 1 whenever
    # V <= tv, so edge blocks are usually fetched exactly once.
    tv = max(1024, _round_up(min(tv, _round_up(V, 1024)), 1024))
    V_pad = _round_up(V, tv)
    n_vt = V_pad // tv
    q_dim = tv // 128

    # Edge tile: multiple of 128 (lane-dense edge blocks).
    te = max(128, _round_up(min(te, _round_up(E, 128)), 128))
    E_pad = _round_up(E, te)
    n_et = E_pad // te

    tgt = edgeij_pair[1].astype(jnp.int32)
    c_ij = edge_attr[:, 1].astype(jnp.float32)
    if E_pad != E:
        # Sentinel target -1 never matches a vertex row; padded c is 0 anyway.
        tgt = jnp.concatenate([tgt, jnp.full((E_pad - E,), -1, jnp.int32)])
        c_ij = jnp.concatenate([c_ij, jnp.zeros((E_pad - E,), jnp.float32)])

    # Fused, lane-dense edge stream: row 0 = target ids, row 1 = c_ij bits.
    edges = jnp.stack([tgt, lax.bitcast_convert_type(c_ij, jnp.int32)], axis=0)

    cost = pl.CostEstimate(
        flops=2 * V_pad * E_pad,               # MXU MACs dominate
        transcendentals=0,
        bytes_accessed=8 * E_pad * n_vt + 4 * V_pad,
    )

    out = pl.pallas_call(
        cbar_kernel,
        out_shape=jax.ShapeDtypeStruct((n_vt * q_dim, 128), jnp.float32),
        grid=(n_vt, n_et),                     # reduction (edge) axis last
        in_specs=[pl.BlockSpec((2, te), lambda i, e: (0, e))],
        out_specs=pl.BlockSpec((q_dim, 128), lambda i, e: (i, 0)),
        compiler_params=pltpu.CompilerParams(
            dimension_semantics=("parallel", "arbitrary")),
        cost_estimate=cost,
    )(edges)

    # Row-major flatten of (n_vt*q_dim, 128) is exactly the padded vertex order.
    cbar = out.reshape(-1)[:V]
    b_i = vertex_attr[:, 0].astype(jnp.float32)
    x_i = vertex_attr[:, 1].astype(jnp.float32)
    # Cheap concat done in the wrapper (lane-sparse (V,3) never hits the kernel).
    return jnp.stack([b_i, x_i, b_i - cbar], axis=1)            # (V, 3)


if __name__ == "__main__":
    # Small shapes; V and E deliberately not multiples of the tiles, to
    # exercise the padding paths.
    V, E = 200, 1000
    key = jax.random.PRNGKey(0)
    k1, k2, k3, k4 = jax.random.split(key, 4)

    vertex_attr = jax.random.normal(k1, (V, 2), dtype=jnp.float32)
    edge_src = jax.random.randint(k2, (E,), 0, V, dtype=jnp.int32)
    edge_dst = jax.random.randint(k3, (E,), 0, V, dtype=jnp.int32)
    edgeij_pair = jnp.stack([edge_src, edge_dst], axis=0)       # (2, E)
    edge_attr = jax.random.normal(k4, (E, 2), dtype=jnp.float32)

    # te=256 -> 4 edge grid steps, exercising accumulation across the
    # "arbitrary" axis; V=200 -> one vertex tile (tv=1024, q_dim=8).
    out = jax.block_until_ready(
        vertex_update(vertex_attr, edgeij_pair, edge_attr, te=256))

    # Pure-JAX reference (same scatter-sum-onto-target aggregation).
    c = edge_attr[:, 1]
    cbar_ref = jax.ops.segment_sum(c, edge_dst, num_segments=V)
    b = vertex_attr[:, 0]
    x = vertex_attr[:, 1]
    expected = jnp.stack([b, x, b - cbar_ref], axis=1)

    assert out.shape == (V, 3)
    # MXU f32 multi-pass accumulation order differs from segment_sum's
    # sequential adds -> match to tolerance, not bitwise.
    assert jnp.allclose(out, expected, atol=1e-4, rtol=1e-4)
    print("KERNEL_OK")
</pallas_src>

<mosaic_0001>
module attributes {stable_mosaic.version = 11 : i64} {
  func.func @cbar_kernel(%arg0: i32, %arg1: i32, %arg2: memref<2x256xi32, #tpu.memory_space<vmem>>, %arg3: memref<8x128xf32, #tpu.memory_space<vmem>>) attributes {dimension_semantics = [#tpu.dimension_semantics<parallel>, #tpu.dimension_semantics<arbitrary>], iteration_bounds = array<i64: 1, 4>, scalar_prefetch = 0 : i64, scratch_operands = 0 : i64, tpu.core_type = #tpu.core_type<tc>, window_params = [{transform_indices = @transform_0, window_bounds = array<i64: 2, 256>}, {transform_indices = @transform_1, window_bounds = array<i64: 8, 128>}]} {
    %c0_i32 = arith.constant 0 : i32
    %0 = arith.cmpi eq, %arg1, %c0_i32 : i32
    %1 = arith.extui %0 : i1 to i32
    %c0_i32_0 = arith.constant 0 : i32
    %2 = arith.cmpi ne, %1, %c0_i32_0 : i32
    scf.if %2 {
      %cst_8 = arith.constant 0.000000e+00 : f32
      %31 = vector.broadcast %cst_8 : f32 to vector<8x128xf32>
      %c0_9 = arith.constant 0 : index
      %c0_10 = arith.constant 0 : index
      %32 = vector.load %arg3[%c0_9, %c0_10] : memref<8x128xf32, #tpu.memory_space<vmem>>, vector<8x128xf32>
      tpu.vector_store %arg3[%c0_9, %c0_10], %31 {strides = array<i32>} : memref<8x128xf32, #tpu.memory_space<vmem>>, vector<8x128xf32>,
    } else {
    }
    %c0 = arith.constant 0 : index
    %c0_1 = arith.constant 0 : index
    %3 = vector.load %arg2[%c0, %c0_1] : memref<2x256xi32, #tpu.memory_space<vmem>>, vector<1x256xi32>
    %c1 = arith.constant 1 : index
    %c0_2 = arith.constant 0 : index
    %4 = vector.load %arg2[%c1, %c0_2] : memref<2x256xi32, #tpu.memory_space<vmem>>, vector<1x256xi32>
    %5 = tpu.bitcast %4 : vector<1x256xi32> -> vector<1x256xf32>
    %6 = tpu.iota {dimensions = array<i32: 0>} : vector<128x1xi32>
    %c127_i32 = arith.constant 127 : i32
    %7 = vector.broadcast %c127_i32 : i32 to vector<1x256xi32>
    %8 = arith.andi %3, %7 : vector<1x256xi32>
    %9 = vector.broadcast %8 : vector<1x256xi32> to vector<128x256xi32>
    %10 = vector.broadcast %6 : vector<128x1xi32> to vector<128x256xi32>
    %11 = arith.cmpi eq, %9, %10 : vector<128x256xi32>
    %cst = arith.constant 0.000000e+00 : f32
    %12 = vector.shape_cast %5 : vector<1x256xf32> to vector<1x256xf32>
    %13 = vector.broadcast %12 : vector<1x256xf32> to vector<128x256xf32>
    %14 = vector.broadcast %cst : f32 to vector<128x256xf32>
    %15 = arith.select %11, %13, %14 : vector<128x256xi1>, vector<128x256xf32>
    %c8_i32 = arith.constant 8 : i32
    %16 = arith.muli %arg0, %c8_i32 : i32
    %17 = tpu.iota {dimensions = array<i32: 0>} : vector<8x1xi32>
    %18 = vector.broadcast %16 : i32 to vector<8x1xi32>
    %19 = arith.addi %18, %17 : vector<8x1xi32>
    %c7_i32 = arith.constant 7 : i32
    %20 = vector.broadcast %c7_i32 : i32 to vector<1x256xi32>
    %21 = arith.shrsi %3, %20 : vector<1x256xi32>
    %22 = vector.broadcast %21 : vector<1x256xi32> to vector<8x256xi32>
    %23 = vector.broadcast %19 : vector<8x1xi32> to vector<8x256xi32>
    %24 = arith.cmpi eq, %22, %23 : vector<8x256xi32>
    %25 = arith.extui %24 : vector<8x256xi1> to vector<8x256xi32>
    %26 = arith.sitofp %25 : vector<8x256xi32> to vector<8x256xf32>
    %c0_3 = arith.constant 0 : index
    %c0_4 = arith.constant 0 : index
    %27 = vector.load %arg3[%c0_3, %c0_4] : memref<8x128xf32, #tpu.memory_space<vmem>>, vector<8x128xf32>
    %cst_5 = arith.constant dense<0.000000e+00> : vector<8x128xf32>
    %28 = tpu.matmul %26, %15, %cst_5 {dimension_numbers = #tpu.dot_dimension_numbers<[1], [1], [0], [0], [0, 0, 1, 0], [], []>, precision = #tpu.contract_precision<fp32>} : vector<8x256xf32>, vector<128x256xf32>, vector<8x128xf32> -> vector<8x128xf32>
    %29 = arith.addf %27, %28 : vector<8x128xf32>
    %c0_6 = arith.constant 0 : index
    %c0_7 = arith.constant 0 : index
    %30 = vector.load %arg3[%c0_6, %c0_7] : memref<8x128xf32, #tpu.memory_space<vmem>>, vector<8x128xf32>
    tpu.vector_store %arg3[%c0_6, %c0_7], %29 {strides = array<i32>} : memref<8x128xf32, #tpu.memory_space<vmem>>, vector<8x128xf32>,
    return
  }
  func.func @transform_0(%arg0: i32, %arg1: i32) -> (i32, i32) {
    %c0_i32 = arith.constant 0 : i32
    %c0_i32_0 = arith.constant 0 : i32
    return %c0_i32, %arg1 : i32, i32
  }
  func.func @transform_1(%arg0: i32, %arg1: i32) -> (i32, i32) {
    %c0_i32 = arith.constant 0 : i32
    %c0_i32_0 = arith.constant 0 : i32
    return %arg0, %c0_i32 : i32, i32
  }
}

</mosaic_0001>

<bundles_post_ra>
// kernel: tpu_custom_call.1
= control target key start
LH: loop header
LB: loop body
LE: loop exit
PB: predicated region body
PF: predicated region fallthrough
CT: control target
= control target key end

     0   :  { %6 = vsyncpa [#allocation3], 0  ;;  %s2011_s0 = inlined_call_operand.hbm [shape: s32[2,1024], index: 0, kind: input, shape index: {}]   ;;  %s2012_s1 = inlined_call_operand.hbm [shape: f32[8,128], index: 1, kind: output, shape index: {}]  }
   0x1   :  { %8 = vsyncpa [#allocation3 + $0x1], 0 }
   0x2   :  { %9 = vsyncpa [#allocation4], 0  ;;  %s1224_s6 = smov 0   ;;  %s1226_s7 = smov 0  }
   0x3   :  { %s1228_s8 = smov 0   ;;  %s1230_s9 = smov 0  }
   0x4   :  { %s1232_s10 = smov 0   ;;  %s1234_s11 = smov 0  }
   0x5 LB: > { %s1008_s12 = sadd.s32 4294967295, %s1208_s11   ;;  %s24_s13 = sadd.s32 1, %s1204_s10  ;;  %s1208_s11 = sphi %s1234_s11, %s15_s11   ;;  %s1204_s10 = sphi %s1232_s10, %s2078_s10   ;;  %s1200_s9 = sphi %s1230_s9, %s2077_s9   ;;  %s1196_s8 = sphi %s1228_s8, %s2076_s8   ;;  %s1192_s7 = sphi %s1226_s7, %s2075_s7   ;;  %s1188_s6 = sphi %s1224_s6, %s2074_s6  }
   0x6   : > { %p25_p0 = scmp.ge.s32.totalorder %s24_s13, 4  ;;  %s34_s14 = sadd.s32 1, %s1196_s8 }
   0x7   : > { %p41_p1 = scmp.ne.s32.totalorder %s1196_s8, %s1192_s7  ;;  %p42_p2 = scmp.eq.s32.totalorder %s1208_s11, 0 }
   0x8   : > { %s2080_s13 = smov (%p25_p0, %s24_s13), 0  ;;  %p47_p4 = scmp.ne.s32.totalorder %s1192_s7, %s1188_s6 }
   0x9   : > { %p1260_p3 = por %p42_p2, %p41_p1  ;;  %s31_s16 = ssub.s32 %s1204_s10, %s2080_s13 }
   0xa   : > { %p48_p5 = scmp.eq.s32.totalorder %s1008_s12, 0  ;;  %p32_p6 = scmp.eq.s32.totalorder %s31_s16, 0 }
   0xb   : > { %p1041_p8 = scmp.lt.s32.totalorder %s1208_s11, 4  ;;  %s97_s19 = sand.u32 1, %s1196_s8  }
   0xc   : > { %p1269_p7 = por %p48_p5, %p47_p4  ;;  %s1030_s20 = sshll.u32 %s1204_s10, 2 }
   0xd   : > { %s1275_s18 = scalar_select %p32_p6, %s1196_s8, %s34_s14  }
   0xe   : > { %s1011_s21 = sshll.u32 %s97_s19, 2  ;;  %s106_s24 = scalar_lea.hbm %s2011_s0, %s1030_s20 }
   0xf   : > { %s108_s25 = sshll.u32 %s106_s24, 4  ;;  %s101_s26 = scalar_lea.vmem [#allocation2], %s1011_s21  ;;  %s109_s25 = int_to_ptr.hbm [resolvable:$true] %s108_s25 }
  0x10   : > { %s110_s27 = sshll.u32 %s101_s26, 4  ;;  %p1038_p9 = pnand %p1041_p8, %p1260_p3  ;;  %s111_s27 = int_to_ptr.vmem [resolvable:$true] %s110_s27 }
  0x11   : > { %p1014_p10 = scmp.ge.s32.totalorder %s1208_s11, 1  ;;  %p115_p11 = scmp.lt.s32.totalorder %s1208_s11, 5 }
  0x12   : > { %s98_s28 = scalar_lea.sflag [#allocation3], %s97_s19 }
  0x13   : > { %1040 = dma.hbm_to_vmem [thread:$0]  (!%p1038_p9), %s109_s25, 64, %s111_s27, %s98_s28  }
  0x14   : > { %p116_p12 = pnand %p1014_p10, %p115_p11 }
  0x16   : > { %119 = sbr.rel (%p116_p12) target bundleno = 387 (0x183), region = 24 }
  0x1b   : > { %s121_s29 = sand.u32 1, %s1192_s7  }
  0x1c   : > { %s1015_s30 = sshll.u32 %s121_s29, 2  ;;  %s122_s2 = scalar_lea.sflag [#allocation3], %s121_s29 }
  0x1d   : > { %s125_s3 = scalar_lea.vmem [#allocation2], %s1015_s30 }
  0x1e   : > { %1179 = dma.done.wait (%p1269_p7), %s122_s2, 64  }
  0x1f   : > { %1181 = vsyncadd (%p1269_p7), %s122_s2, 4294967232  ;;  %p1016_p13 = scmp.ne.s32.totalorder %s1200_s9, 0 }
  0x21   : > { %144 = sbr.rel (%p1016_p13) target bundleno = 40 (0x28), region = 32 }
  0x26   : > { %v1210_v0 = vmov 0.0  }
  0x27   : > { %145 = vst [vmem:[#allocation5] sm:$0xff] %v1210_v0 }
  0x28 PF: > { %v1292_v1 = vld [vmem:[%s125_s3] ss:$2 sm:$0x3]  ;;  %v1294_v2 = vld [vmem:[%s125_s3 + $0x1] ss:$2 sm:$0x3]  ;;  %v153_v3 = vlaneseq }
  0x29   : > { %v149_v4 = vperm.slane %v1294_v2, 0  ;;  %v170_v5 = vand.u32 127, %v1292_v1  ;;  %s1213_s4 = smov [#allocation5]   ;;  %s946_s14 = sshll.u32 %s2012_s1, 4  ;;  %s947_s14 = int_to_ptr.hbm [resolvable:$true] %s946_s14 }
  0x2a   : > { %v1298_v6 = vshrl.u32 %v153_v3, 7  ;;  %s944_s5 = sshll.u32 %s1213_s4, 4  ;;  %p1042_p0 = scmp.eq.s32.totalorder %s1008_s12, 3  ;;  %s945_s5 = int_to_ptr.vmem [resolvable:$true] %s944_s5 }
  0x2b   : > { %v1302_v7 = vperm.slane %v170_v5, 0  ;;  %v1304_v8 = vperm.slane %v149_v4, 0 }
  0x2c   : > { %v1307_v9 = vadd.s32 120, %v1298_v6  ;;  %v1310_v10 = vadd.s32 112, %v1298_v6  ;;  %v1313_v11 = vadd.s32 104, %v1298_v6  ;;  %v1316_v12 = vadd.s32 96, %v1298_v6 }
  0x2d   : > { %v1319_v13 = vadd.s32 88, %v1298_v6  ;;  %v1322_v14 = vadd.s32 80, %v1298_v6  ;;  %v1347_v23 = vadd.s32 72, %v1298_v6  ;;  %v1374_v32 = vadd.s32 64, %v1298_v6 }
  0x2e   : > { %vm203_vm0 = vcmp.eq.s32.totalorder %v1302_v7, %v1307_v9  ;;  %vm201_vm1 = vcmp.eq.s32.totalorder %v1302_v7, %v1310_v10  ;;  %vm199_vm2 = vcmp.eq.s32.totalorder %v1302_v7, %v1313_v11  ;;  %vm197_vm3 = vcmp.eq.s32.totalorder %v1302_v7, %v1316_v12 }
  0x2f   : > { %v237_v15 = vsel %vm203_vm0, %v1304_v8, 0.0  ;;  %v235_v16 = vsel %vm201_vm1, %v1304_v8, 0.0  ;;  %v233_v17 = vsel %vm199_vm2, %v1304_v8, 0.0  ;;  %v231_v18 = vsel %vm197_vm3, %v1304_v8, 0.0 }
  0x30   : > { %v1336_v19 = vand.u32 4294901760, %v237_v15  ;;  %v1338_v20 = vand.u32 4294901760, %v235_v16  ;;  %v1340_v21 = vand.u32 4294901760, %v233_v17  ;;  %v1342_v22 = vand.u32 4294901760, %v231_v18 }
  0x31   : > { %vm195_vm4 = vcmp.eq.s32.totalorder %v1302_v7, %v1319_v13  ;;  %vm193_vm5 = vcmp.eq.s32.totalorder %v1302_v7, %v1322_v14  ;;  %vm191_vm6 = vcmp.eq.s32.totalorder %v1302_v7, %v1347_v23  ;;  %vm189_vm7 = vcmp.eq.s32.totalorder %v1302_v7, %v1374_v32 }
  0x32   : > { %253 = vmatpush.xpose.msra.mxu0 %v1336_v19  ;;  %v1351_v24 = vsub.f32 %v237_v15, %v1336_v19  ;;  %449 = vmatpush.xpose.msra.mxu3 %v1336_v19  ;;  %v1355_v25 = vsub.f32 %v235_v16, %v1338_v20  ;;  %v1358_v26 = vsub.f32 %v233_v17, %v1340_v21  ;;  %v229_v27 = vsel %vm195_vm4, %v1304_v8, 0.0 }
  0x33   : > { %v1366_v30 = vand.u32 4294901760, %v229_v27  ;;  %v1369_v31 = vsub.f32 %v231_v18, %v1342_v22  ;;  %v227_v36 = vsel %vm193_vm5, %v1304_v8, 0.0  ;;  %v225_v39 = vsel %vm191_vm6, %v1304_v8, 0.0 }
  0x34   : > { %396 = vmatpush.xpose.msra.mxu2 %v1351_v24  ;;  %v2026_v28 = vand.u32 4294901760, %v1351_v24  ;;  %v2024_v29 = vand.u32 4294901760, %v1355_v25  ;;  %v2023_v35 = vand.u32 4294901760, %v1358_v26  ;;  %v1387_v38 = vand.u32 4294901760, %v227_v36 }
  0x35   : > { %v2021_v42 = vand.u32 4294901760, %v1369_v31  ;;  %v1398_v43 = vsub.f32 %v229_v27, %v1366_v30  ;;  %v1402_v44 = vadd.s32 56, %v1298_v6  ;;  %v1405_v45 = vand.u32 4294901760, %v225_v39 }
  0x36   : > { %255 = vmatpush.xpose.msra.mxu0 %v1338_v20  ;;  %v296_v33 = vsub.f32 %v1351_v24, %v2026_v28  ;;  %451 = vmatpush.xpose.msra.mxu3 %v1338_v20  ;;  %v302_v34 = vsub.f32 %v1355_v25, %v2024_v29  ;;  %v308_v41 = vsub.f32 %v1358_v26, %v2023_v35  ;;  %v223_v46 = vsel %vm189_vm7, %v1304_v8, 0.0 }
  0x37   : > { %v314_v48 = vsub.f32 %v1369_v31, %v2021_v42  ;;  %v2019_v49 = vand.u32 4294901760, %v1398_v43  ;;  %v1414_v50 = vsub.f32 %v227_v36, %v1387_v38  ;;  %vm187_vm8 = vcmp.eq.s32.totalorder %v1302_v7, %v1402_v44 }
  0x38   : > { %v297_v37 = vand.u32 4294901760, %v296_v33  ;;  %399 = vmatpush.xpose.msra.mxu2 %v1355_v25  ;;  %v303_v40 = vand.u32 4294901760, %v302_v34  ;;  %v309_v47 = vand.u32 4294901760, %v308_v41  ;;  %v1421_v51 = vadd.s32 48, %v1298_v6 }
  0x39   : > { %v1423_v52 = vand.u32 4294901760, %v223_v46  ;;  %v1426_v53 = vsub.f32 %v225_v39, %v1405_v45  ;;  %v315_v54 = vand.u32 4294901760, %v314_v48  ;;  %v320_v55 = vsub.f32 %v1398_v43, %v2019_v49 }
  0x3a   : > { %257 = vmatpush.xpose.msra.mxu0 %v1340_v21  ;;  %298 = vmatpush.xpose.msra.mxu1 %v297_v37  ;;  %v2018_v56 = vand.u32 4294901760, %v1414_v50  ;;  %v221_v57 = vsel %vm187_vm8, %v1304_v8, 0.0  ;;  %v1436_v58 = vadd.s32 40, %v1298_v6  ;;  %vm185_vm9 = vcmp.eq.s32.totalorder %v1302_v7, %v1421_v51 }
  0x3b   : > { %453 = vmatpush.xpose.msra.mxu3 %v1340_v21  ;;  %v1441_v59 = vand.u32 4294901760, %v221_v57  ;;  %v1444_v60 = vsub.f32 %v223_v46, %v1423_v52  ;;  %v321_v61 = vand.u32 4294901760, %v320_v55  ;;  %v2017_v63 = vand.u32 4294901760, %v1426_v53 }
  0x3c   : > { %402 = vmatpush.xpose.msra.mxu2 %v1358_v26  ;;  %v326_v62 = vsub.f32 %v1414_v50, %v2018_v56  ;;  %v219_v0 = vsel %vm185_vm9, %v1304_v8, 0.0  ;;  %vm183_vm10 = vcmp.eq.s32.totalorder %v1302_v7, %v1436_v58  ;;  %v1457_v3 = vadd.s32 32, %v1298_v6 }
  0x3d   : > { %v2015_v4 = vand.u32 4294901760, %v1444_v60  ;;  %v1461_v15 = vsub.f32 %v221_v57, %v1441_v59  ;;  %v332_v17 = vsub.f32 %v1426_v53, %v2017_v63  ;;  %v1467_v18 = vand.u32 4294901760, %v219_v0 }
  0x3e   : > { %259 = vmatpush.xpose.msra.mxu0 %v1342_v22  ;;  %304 = vmatpush.xpose.msra.mxu1 %v303_v40  ;;  %v327_v16 = vand.u32 4294901760, %v326_v62  ;;  %v217_v27 = vsel %vm183_vm10, %v1304_v8, 0.0  ;;  %v1472_v33 = vadd.s32 24, %v1298_v6  ;;  %vm181_vm11 = vcmp.eq.s32.totalorder %v1302_v7, %v1457_v3 }
  0x3f   : > { %455 = vmatpush.xpose.msra.mxu3 %v1342_v22  ;;  %v338_v34 = vsub.f32 %v1444_v60, %v2015_v4  ;;  %v1480_v36 = vand.u32 4294901760, %v217_v27  ;;  %v2013_v37 = vand.u32 4294901760, %v1461_v15  ;;  %v333_v39 = vand.u32 4294901760, %v332_v17 }
  0x40   : > { %405 = vmatpush.xpose.msra.mxu2 %v1369_v31  ;;  %v1485_v40 = vsub.f32 %v219_v0, %v1467_v18  ;;  %v215_v41 = vsel %vm181_vm11, %v1304_v8, 0.0  ;;  %vm179_vm12 = vcmp.eq.s32.totalorder %v1302_v7, %v1472_v33  ;;  %v1492_v46 = vadd.s32 16, %v1298_v6 }
  0x41   : > { %v344_v48 = vsub.f32 %v1461_v15, %v2013_v37  ;;  %v150_v55 = vperm.slane %v1294_v2, 1  ;;  %v1503_v57 = vand.u32 4294901760, %v215_v41  ;;  %v213_v62 = vsel %vm179_vm12, %v1304_v8, 0.0 }
  0x42   : > { %261 = vmatpush.xpose.msra.mxu0 %v1366_v30  ;;  %310 = vmatpush.xpose.msra.mxu1 %v309_v47  ;;  %v339_v47 = vand.u32 4294901760, %v338_v34  ;;  %v1509_v0 = vperm.slane %v170_v5, 1  ;;  %vm177_vm13 = vcmp.eq.s32.totalorder %v1302_v7, %v1492_v46  ;;  %v1516_v2 = vadd.s32 8, %v1298_v6 }
  0x43   : > { %457 = vmatpush.xpose.msra.mxu3 %v1366_v30  ;;  %v1518_v17 = vand.u32 4294901760, %v213_v62  ;;  %v1521_v34 = vperm.slane %v150_v55, 0  ;;  %v211_v37 = vsel %vm177_vm13, %v1304_v8, 0.0  ;;  %vm173_vm1 = vcmp.eq.s32.totalorder %v1302_v7, %v1298_v6 }
  0x44   : > { %408 = vmatpush.xpose.msra.mxu2 %v1398_v43  ;;  %vm204_vm14 = vcmp.eq.s32.totalorder %v1509_v0, %v1307_v9  ;;  %vm175_vm15 = vcmp.eq.s32.totalorder %v1302_v7, %v1516_v2  ;;  %vm202_vm0 = vcmp.eq.s32.totalorder %v1509_v0, %v1310_v10  ;;  %vm200_vm2 = vcmp.eq.s32.totalorder %v1509_v0, %v1313_v11 }
  0x45   : > { %v207_v56 = vsel %vm173_vm1, %v1304_v8, 0.0  ;;  %vm198_vm3 = vcmp.eq.s32.totalorder %v1509_v0, %v1316_v12  ;;  %vm196_vm4 = vcmp.eq.s32.totalorder %v1509_v0, %v1319_v13  ;;  %vm194_vm5 = vcmp.eq.s32.totalorder %v1509_v0, %v1322_v14 }
  0x46   : > { %263 = vmatpush.xpose.msra.mxu0 %v1387_v38  ;;  %316 = vmatpush.xpose.msra.mxu1 %v315_v54  ;;  %v1499_v54 = vsub.f32 %v217_v27, %v1480_v36  ;;  %v232_v35 = vsel %vm198_vm3, %v1521_v34, 0.0  ;;  %vm192_vm6 = vcmp.eq.s32.totalorder %v1509_v0, %v1347_v23  ;;  %vm190_vm7 = vcmp.eq.s32.totalorder %v1509_v0, %v1374_v32 }
  0x47   : > { %459 = vmatpush.xpose.msra.mxu3 %v1387_v38  ;;  %v224_v32 = vsel %vm190_vm7, %v1521_v34, 0.0  ;;  %vm188_vm8 = vcmp.eq.s32.totalorder %v1509_v0, %v1402_v44  ;;  %vm186_vm9 = vcmp.eq.s32.totalorder %v1509_v0, %v1421_v51  ;;  %vm184_vm10 = vcmp.eq.s32.totalorder %v1509_v0, %v1436_v58 }
  0x48   : > { %411 = vmatpush.xpose.msra.mxu2 %v1414_v50  ;;  %v2016_v27 = vand.u32 4294901760, %v1499_v54  ;;  %v220_v51 = vsel %vm186_vm9, %v1521_v34, 0.0  ;;  %vm182_vm11 = vcmp.eq.s32.totalorder %v1509_v0, %v1457_v3  ;;  %vm180_vm13 = vcmp.eq.s32.totalorder %v1509_v0, %v1472_v33 }
  0x4a   : > { %265 = vmatpush.xpose.msra.mxu0 %v1405_v45  ;;  %322 = vmatpush.xpose.msra.mxu1 %v321_v61  ;;  %v2014_v61 = vand.u32 4294901760, %v1485_v40  ;;  %v356_v55 = vsub.f32 %v1499_v54, %v2016_v27 }
  0x4b   : > { %461 = vmatpush.xpose.msra.mxu3 %v1405_v45 }
  0x4c   : > { %414 = vmatpush.xpose.msra.mxu2 %v1426_v53  ;;  %v350_v5 = vsub.f32 %v1485_v40, %v2014_v61  ;;  %v357_v27 = vand.u32 4294901760, %v356_v55 }
  0x4e   : > { %267 = vmatpush.xpose.msra.mxu0 %v1423_v52  ;;  %328 = vmatpush.xpose.msra.mxu1 %v327_v16  ;;  %v345_v16 = vand.u32 4294901760, %v344_v48  ;;  %v1540_v48 = vsub.f32 %v213_v62, %v1518_v17  ;;  %v351_v9 = vand.u32 4294901760, %v350_v5  ;;  %v209_v62 = vsel %vm175_vm15, %v1304_v8, 0.0 }
  0x4f   : > { %463 = vmatpush.xpose.msra.mxu3 %v1423_v52  ;;  %v1568_v63 = vand.u32 4294901760, %v209_v62  ;;  %v1584_v8 = vand.u32 4294901760, %v207_v56  ;;  %vm176_vm15 = vcmp.eq.s32.totalorder %v1509_v0, %v1516_v2  ;;  %v1212_v2 = vmov 1.0  }
  0x50   : > { %417 = vmatpush.xpose.msra.mxu2 %v1444_v60  ;;  %v2022_v5 = vand.u32 4294901760, %v1540_v48 }
  0x51   : > { %2042 = vst [vmem:[#allocation8_spill] sm:$0xff] %v1568_v63  ;;  %v1587_v42 = vsub.f32 %v209_v62, %v1568_v63 }
  0x52   : > { %269 = vmatpush.xpose.msra.mxu0 %v1441_v59  ;;  %334 = vmatpush.xpose.msra.mxu1 %v333_v39  ;;  %v1528_v39 = vsub.f32 %v215_v41, %v1503_v57  ;;  %v238_v41 = vsel %vm204_vm14, %v1521_v34, 0.0  ;;  %vm178_vm14 = vcmp.eq.s32.totalorder %v1509_v0, %v1492_v46 }
  0x53   : > { %465 = vmatpush.xpose.msra.mxu3 %v1441_v59  ;;  %v1555_v10 = vand.u32 4294901760, %v238_v41  ;;  %v2030_v62 = vand.u32 4294901760, %v1587_v42 }
  0x54   : > { %420 = vmatpush.xpose.msra.mxu2 %v1461_v15  ;;  %v2020_v61 = vand.u32 4294901760, %v1528_v39 }
  0x55   : > { %v1576_v11 = vsub.f32 %v238_v41, %v1555_v10  ;;  %v380_v28 = vsub.f32 %v1587_v42, %v2030_v62 }
  0x56   : > { %271 = vmatpush.xpose.msra.mxu0 %v1467_v18  ;;  %340 = vmatpush.xpose.msra.mxu1 %v339_v47  ;;  %v1537_v47 = vand.u32 4294901760, %v211_v37  ;;  %v362_v7 = vsub.f32 %v1528_v39, %v2020_v61 }
  0x57   : > { %467 = vmatpush.xpose.msra.mxu3 %v1467_v18  ;;  %2043 = vst [vmem:[#allocation9_spill] sm:$0xff] %v1576_v11  ;;  %v381_v14 = vand.u32 4294901760, %v380_v28 }
  0x58   : > { %423 = vmatpush.xpose.msra.mxu2 %v1485_v40  ;;  %v1560_v4 = vsub.f32 %v211_v37, %v1537_v47  ;;  %v234_v37 = vsel %vm200_vm2, %v1521_v34, 0.0  ;;  %v363_v61 = vand.u32 4294901760, %v362_v7 }
  0x5a   : > { %273 = vmatpush.xpose.msra.mxu0 %v1480_v36  ;;  %346 = vmatpush.xpose.msra.mxu1 %v345_v16  ;;  %v236_v16 = vsel %vm202_vm0, %v1521_v34, 0.0  ;;  %v2025_v55 = vand.u32 4294901760, %v1560_v4  ;;  %vm174_vm0 = vcmp.eq.s32.totalorder %v1509_v0, %v1298_v6  ;;  %v2058_v0 = vand.u32 4294901760, %v1499_v54 }
  0x5b   : > { %469 = vmatpush.xpose.msra.mxu3 %v1480_v36  ;;  %v1572_v49 = vand.u32 4294901760, %v236_v16 }
  0x5c   : > { %426 = vmatpush.xpose.msra.mxu2 %v1499_v54  ;;  %v374_v12 = vsub.f32 %v1560_v4, %v2025_v55  ;;  %v1619_v55 = vand.u32 4294901760, %v232_v35 }
  0x5d   : > { %v1593_v41 = vsub.f32 %v236_v16, %v1572_v49  ;;  %v1606_v16 = vsub.f32 %v207_v56, %v1584_v8  ;;  %v230_v56 = vsel %vm196_vm4, %v1521_v34, 0.0 }
  0x5e   : > { %275 = vmatpush.xpose.msra.mxu0 %v1503_v57  ;;  %352 = vmatpush.xpose.msra.mxu1 %v351_v9  ;;  %v368_v9 = vsub.f32 %v1540_v48, %v2022_v5  ;;  %v1595_v5 = vand.u32 4294901760, %v234_v37  ;;  %v375_v13 = vand.u32 4294901760, %v374_v12  ;;  %v1636_v12 = vsub.f32 %v232_v35, %v1619_v55 }
  0x5f   : > { %471 = vmatpush.xpose.msra.mxu3 %v1503_v57  ;;  %2044 = vst [vmem:[#allocation10_spill] sm:$0xff] %v1593_v41  ;;  %v1638_v62 = vand.u32 4294901760, %v230_v56 }
  0x60   : > { %429 = vmatpush.xpose.msra.mxu2 %v1528_v39  ;;  %v369_v7 = vand.u32 4294901760, %v368_v9  ;;  %v2031_v9 = vand.u32 4294901760, %v1593_v41  ;;  %v1613_v29 = vsub.f32 %v234_v37, %v1595_v5  ;;  %v228_v37 = vsel %vm194_vm5, %v1521_v34, 0.0 }
  0x61   : > { %v654_v23 = vand.u32 4294901760, %v1636_v12  ;;  %v1656_v28 = vsub.f32 %v230_v56, %v1638_v62 }
  0x62   : > { %277 = vmatpush.xpose.msra.mxu0 %v1518_v17  ;;  %358 = vmatpush.xpose.msra.mxu1 %v357_v27  ;;  %v2027_v27 = vand.u32 4294901760, %v1576_v11  ;;  %2045 = vst [vmem:[#allocation11_spill] sm:$0xff] %v1613_v29 }
  0x63   : > { %473 = vmatpush.xpose.msra.mxu3 %v1518_v17  ;;  %v655_v56 = vsub.f32 %v1636_v12, %v654_v23 }
  0x64   : > { %432 = vmatpush.xpose.msra.mxu2 %v1540_v48 }
  0x66   : > { %279 = vmatpush.xpose.msra.mxu0 %v1537_v47  ;;  %364 = vmatpush.xpose.msra.mxu1 %v363_v61  ;;  %v637_v61 = vsub.f32 %v1576_v11, %v2027_v27  ;;  %v643_v27 = vsub.f32 %v1593_v41, %v2031_v9  ;;  %v2046_v9 = vand.u32 4294901760, %v1606_v16  ;;  %v2048_v41 = vand.u32 4294901760, %v1613_v29 }
  0x67   : > { %475 = vmatpush.xpose.msra.mxu3 %v1537_v47 }
  0x68   : > { %435 = vmatpush.xpose.msra.mxu2 %v1560_v4  ;;  %v386_v11 = vsub.f32 %v1606_v16, %v2046_v9  ;;  %v644_v35 = vand.u32 4294901760, %v643_v27 }
  0x6a   : > { %281 = vmatpush.xpose.msra.mxu0 %v1568_v63  ;;  %370 = vmatpush.xpose.msra.mxu1 %v369_v7  ;;  %v638_v7 = vand.u32 4294901760, %v637_v61  ;;  %v2047_v61 = vand.u32 4294901760, %v1351_v24  ;;  %v226_v24 = vsel %vm192_vm6, %v1521_v34, 0.0  ;;  %v387_v27 = vand.u32 4294901760, %v386_v11 }
  0x6b   : > { %477 = vmatpush.xpose.msra.mxu3 %v1568_v63  ;;  %v649_v63 = vsub.f32 %v1613_v29, %v2048_v41  ;;  %v2049_v41 = vand.u32 4294901760, %v1355_v25  ;;  %v2050_v25 = vand.u32 4294901760, %v1358_v26  ;;  %v1685_v11 = vand.u32 4294901760, %v224_v32 }
  0x6c   : > { %438 = vmatpush.xpose.msra.mxu2 %v1587_v42  ;;  %v222_v26 = vsel %vm188_vm8, %v1521_v34, 0.0 }
  0x6d   : > { %v650_v9 = vand.u32 4294901760, %v649_v63 }
  0x6e   : > { %283 = vmatpush.xpose.msra.mxu0 %v1584_v8  ;;  %376 = vmatpush.xpose.msra.mxu1 %v375_v13  ;;  %v1658_v13 = vand.u32 4294901760, %v228_v37 }
  0x6f   : > { %479 = vmatpush.xpose.msra.mxu3 %v1584_v8 }
  0x70   : > { %441 = vmatpush.xpose.msra.mxu2 %v1606_v16  ;;  %v1673_v29 = vsub.f32 %v228_v37, %v1658_v13  ;;  %v656_v37 = vand.u32 4294901760, %v655_v56 }
  0x72   : > { %490 = vmatpush.xpose.msrb.mxu0 %v2047_v61  ;;  %382 = vmatpush.xpose.msra.mxu1 %v381_v14  ;;  %v660_v61 = vand.u32 4294901760, %v1656_v28 }
  0x73   : > { %639 = vmatpush.xpose.msrb.mxu3 %v638_v7  ;;  %v1666_v7 = vand.u32 4294901760, %v226_v24 }
  0x74   : > { %594 = vmatpush.xpose.msrb.mxu2 %v1555_v10  ;;  %v661_v14 = vsub.f32 %v1656_v28, %v660_v61 }
  0x75   : > { %v1683_v63 = vsub.f32 %v226_v24, %v1666_v7  ;;  %v1700_v24 = vsub.f32 %v224_v32, %v1685_v11 }
  0x76   : > { %494 = vmatpush.xpose.msrb.mxu0 %v2049_v41  ;;  %388 = vmatpush.xpose.msra.mxu1 %v387_v27  ;;  %v662_v27 = vand.u32 4294901760, %v661_v14 }
  0x77   : > { %645 = vmatpush.xpose.msrb.mxu3 %v644_v35  ;;  %v2039_v35 = vand.u32 4294901760, %v1673_v29  ;;  %v2038_v44 = vand.u32 4294901760, %v1683_v63  ;;  %v2037_v32 = vand.u32 4294901760, %v1700_v24 }
  0x78   : > { %596 = vmatpush.xpose.msrb.mxu2 %v1572_v49 }
  0x79   : > { %v667_v41 = vsub.f32 %v1673_v29, %v2039_v35  ;;  %v673_v56 = vsub.f32 %v1683_v63, %v2038_v44 }
  0x7a   : > { %498 = vmatpush.xpose.msrb.mxu0 %v2050_v25  ;;  %557 = vmatpush.xpose.msrb.mxu1 %v1336_v19  ;;  %v2051_v19 = vand.u32 4294901760, %v1369_v31  ;;  %v2052_v31 = vand.u32 4294901760, %v1398_v43  ;;  %v1719_v25 = vand.u32 4294901760, %v220_v51  ;;  %v2053_v43 = vand.u32 4294901760, %v1414_v50 }
  0x7b   : > { %651 = vmatpush.xpose.msrb.mxu3 %v650_v9  ;;  %v1705_v9 = vand.u32 4294901760, %v222_v26 }
  0x7c   : > { %598 = vmatpush.xpose.msrb.mxu2 %v1595_v5 }
  0x7d   : > { %v1722_v14 = vsub.f32 %v222_v26, %v1705_v9  ;;  %v674_v26 = vand.u32 4294901760, %v673_v56 }
  0x7e   : > { %502 = vmatpush.xpose.msrb.mxu0 %v2051_v19  ;;  %559 = vmatpush.xpose.msrb.mxu1 %v1338_v20  ;;  %v242_v20 = vshra.s32 %v1292_v1, 7  ;;  %v679_v19 = vsub.f32 %v1700_v24, %v2037_v32  ;;  %v2059_v1 = vand.u32 4294901760, %v1528_v39 }
  0x7f   : > { %657 = vmatpush.xpose.msrb.mxu3 %v656_v37  ;;  %v668_v37 = vand.u32 4294901760, %v667_v41  ;;  %v1211_v41 = vmov 0.0   ;;  %v684_v50 = vand.u32 4294901760, %v1722_v14 }
  0x80   : > { %600 = vmatpush.xpose.msrb.mxu2 %v1619_v55  ;;  %v1726_v58 = vperm.slane %v242_v20, 0  ;;  %v680_v44 = vand.u32 4294901760, %v679_v19 }
  0x82   : > { %506 = vmatpush.xpose.msrb.mxu0 %v2052_v31  ;;  %561 = vmatpush.xpose.msrb.mxu1 %v1340_v21  ;;  %v218_v21 = vsel %vm184_vm10, %v1521_v34, 0.0  ;;  %vm245_vm12 = vcmp.eq.s32.totalorder %v1726_v58, %v1298_v6 }
  0x83   : > { %663 = vmatpush.xpose.msrb.mxu3 %v662_v27  ;;  %v1741_v27 = vsub.f32 %v220_v51, %v1719_v25  ;;  %v1018_v3 = vsel %vm245_vm12, 1.0, %v1211_v41  ;;  %v1748_v31 = vand.u32 4294901760, %v218_v21  ;;  %1020 = vmatmul.msk.f32.vlgmr.msra.gmra.mxu1 %vm245_vm12, %v1212_v2 }
  0x84   : > { %602 = vmatpush.xpose.msrb.mxu2 %v1638_v62  ;;  %v285_v56 = vsub.f32 %v1018_v3, %v1018_v3  ;;  %v685_v3 = vsub.f32 %v1722_v14, %v684_v50 }
  0x85   : > { %v1764_v35 = vsub.f32 %v218_v21, %v1748_v31 }
  0x86   : > { %510 = vmatpush.xpose.msrb.mxu0 %v2053_v43  ;;  %563 = vmatpush.xpose.msrb.mxu1 %v1342_v22  ;;  %v216_v22 = vsel %vm182_vm11, %v1521_v34, 0.0  ;;  %v286_v51 = vand.u32 4294901760, %v285_v56  ;;  %v2054_v43 = vand.u32 4294901760, %v1426_v53  ;;  %v214_v53 = vsel %vm180_vm13, %v1521_v34, 0.0 }
  0x87   : > { %669 = vmatpush.xpose.msrb.mxu3 %v668_v37  ;;  %444 = vmatmul.f32.vlgmr.msra.gmra.mxu2 %v285_v56  ;;  %v690_v37 = vand.u32 4294901760, %v1741_v27  ;;  %v1758_v32 = vand.u32 4294901760, %v216_v22 }
  0x88   : > { %604 = vmatpush.xpose.msrb.mxu2 %v1658_v13  ;;  %v287_v33 = vsub.f32 %v285_v56, %v286_v51  ;;  %483 = vmatmul.f32.vlgmr.msra.gmra.mxu3 %v286_v51  ;;  %v686_v56 = vand.u32 4294901760, %v685_v3  ;;  %v696_v51 = vand.u32 4294901760, %v1764_v35 }
  0x89   : > { %v691_v21 = vsub.f32 %v1741_v27, %v690_v37  ;;  %v1777_v19 = vsub.f32 %v216_v22, %v1758_v32 }
  0x8a   : > { %514 = vmatpush.xpose.msrb.mxu0 %v2054_v43  ;;  %565 = vmatpush.xpose.msrb.mxu1 %v1366_v30  ;;  %v288_v30 = vand.u32 4294901760, %v287_v33  ;;  %v1780_v43 = vand.u32 4294901760, %v214_v53  ;;  %v697_v22 = vsub.f32 %v1764_v35, %v696_v51 }
  0x8b   : > { %675 = vmatpush.xpose.msrb.mxu3 %v674_v26  ;;  %v2055_v26 = vand.u32 4294901760, %v1444_v60  ;;  %v212_v60 = vsel %vm178_vm14, %v1521_v34, 0.0  ;;  %v692_v46 = vand.u32 4294901760, %v691_v21 }
  0x8c   : > { %606 = vmatpush.xpose.msrb.mxu2 %v1666_v7  ;;  %289 = vmatmul.f32.vlgmr.msra.gmra.mxu0 %v288_v30  ;;  %v1794_v3 = vsub.f32 %v214_v53, %v1780_v43  ;;  %v1796_v33 = vand.u32 4294901760, %v212_v60  ;;  %v698_v30 = vand.u32 4294901760, %v697_v22 }
  0x8e   : > { %518 = vmatpush.xpose.msrb.mxu0 %v2055_v26  ;;  %567 = vmatpush.xpose.msrb.mxu1 %v1387_v38  ;;  %v2056_v38 = vand.u32 4294901760, %v1461_v15  ;;  %v210_v15 = vsel %vm176_vm15, %v1521_v34, 0.0  ;;  %v708_v26 = vand.u32 4294901760, %v1794_v3  ;;  %v1814_v21 = vsub.f32 %v212_v60, %v1796_v33 }
  0x8f   : > { %681 = vmatpush.xpose.msrb.mxu3 %v680_v44  ;;  %v702_v44 = vand.u32 4294901760, %v1777_v19 }
  0x90   : > { %608 = vmatpush.xpose.msrb.mxu2 %v1685_v11  ;;  %v709_v60 = vsub.f32 %v1794_v3, %v708_v26 }
  0x91   : > { %v703_v53 = vsub.f32 %v1777_v19, %v702_v44 }
  0x92   : > { %522 = vmatpush.xpose.msrb.mxu0 %v2056_v38  ;;  %569 = vmatpush.xpose.msrb.mxu1 %v1405_v45  ;;  %v2057_v45 = vand.u32 4294901760, %v1485_v40  ;;  %v208_v40 = vsel %vm174_vm0, %v1521_v34, 0.0 }
  0x93   : > { %687 = vmatpush.xpose.msrb.mxu3 %v686_v56  ;;  %v1816_v56 = vand.u32 4294901760, %v210_v15  ;;  %v704_v38 = vand.u32 4294901760, %v703_v53  ;;  %v1834_v34 = vand.u32 4294901760, %v208_v40 }
  0x94   : > { %610 = vmatpush.xpose.msrb.mxu2 %v1705_v9 }
  0x95   : > { %v1832_v22 = vsub.f32 %v210_v15, %v1816_v56  ;;  %v1847_v15 = vsub.f32 %v208_v40, %v1834_v34 }
  0x96   : > { %526 = vmatpush.xpose.msrb.mxu0 %v2057_v45  ;;  %571 = vmatpush.xpose.msrb.mxu1 %v1423_v52  ;;  %v1822_v52 = vperm.slane %v242_v20, 1 }
  0x97   : > { %693 = vmatpush.xpose.msrb.mxu3 %v692_v46  ;;  %v714_v46 = vand.u32 4294901760, %v1814_v21  ;;  %v720_v20 = vand.u32 4294901760, %v1832_v22 }
  0x98   : > { %612 = vmatpush.xpose.msrb.mxu2 %v1719_v25  ;;  %vm246_vm1 = vcmp.eq.s32.totalorder %v1822_v52, %v1298_v6 }
  0x99   : > { %v715_v54 = vsub.f32 %v1814_v21, %v714_v46  ;;  %v1019_v39 = vsel %vm246_vm1, 1.0, %v1211_v41  ;;  %v721_v53 = vsub.f32 %v1832_v22, %v720_v20 }
  0x9a   : > { %530 = vmatpush.xpose.msrb.mxu0 %v2058_v0  ;;  %573 = vmatpush.xpose.msrb.mxu1 %v1441_v59  ;;  %v710_v59 = vand.u32 4294901760, %v709_v60  ;;  %v1861_v40 = vsub.f32 %v1019_v39, %v1019_v39  ;;  %v2061_v0 = vand.u32 4294901760, %v1560_v4  ;;  %v2063_v60 = vand.u32 4294901760, %v1606_v16  ;;  %v2066_v16 = vld [vmem:[#allocation8_spill] sm:$0xff] }
  0x9b   : > { %699 = vmatpush.xpose.msrb.mxu3 %v698_v30  ;;  %v716_v45 = vand.u32 4294901760, %v715_v54  ;;  %v726_v30 = vand.u32 4294901760, %v1847_v15  ;;  %v2069_v54 = vld [vmem:[#allocation11_spill] sm:$0xff] }
  0x9c   : > { %614 = vmatpush.xpose.msrb.mxu2 %v1748_v31  ;;  %v627_v41 = vand.u32 4294901760, %v1861_v40  ;;  %v2070_v39 = vand.u32 4294901760, %v2069_v54 }
  0x9e   : > { %534 = vmatpush.xpose.msrb.mxu0 %v2059_v1  ;;  %575 = vmatpush.xpose.msrb.mxu1 %v1467_v18  ;;  %v2060_v18 = vand.u32 4294901760, %v1540_v48  ;;  %v722_v48 = vand.u32 4294901760, %v721_v53  ;;  %v2064_v1 = vld [vmem:[#allocation9_spill] sm:$0xff] }
  0x9f   : > { %705 = vmatpush.xpose.msrb.mxu3 %v704_v38  ;;  %v2062_v38 = vand.u32 4294901760, %v1587_v42 }
  0xa0   : > { %616 = vmatpush.xpose.msrb.mxu2 %v1758_v32 }
  0xa2   : > { %538 = vmatpush.xpose.msrb.mxu0 %v2060_v18  ;;  %577 = vmatpush.xpose.msrb.mxu1 %v1480_v36  ;;  %v727_v36 = vsub.f32 %v1847_v15, %v726_v30 }
  0xa3   : > { %711 = vmatpush.xpose.msrb.mxu3 %v710_v59 }
  0xa4   : > { %618 = vmatpush.xpose.msrb.mxu2 %v1780_v43  ;;  %v728_v4 = vand.u32 4294901760, %v727_v36 }
  0xa6   : > { %542 = vmatpush.xpose.msrb.mxu0 %v2061_v0  ;;  %579 = vmatpush.xpose.msrb.mxu1 %v1503_v57  ;;  %v628_v57 = vsub.f32 %v1861_v40, %v627_v41 }
  0xa7   : > { %717 = vmatpush.xpose.msrb.mxu3 %v716_v45 }
  0xa8   : > { %620 = vmatpush.xpose.msrb.mxu2 %v1796_v33  ;;  %v629_v42 = vand.u32 4294901760, %v628_v57 }
  0xaa   : > { %546 = vmatpush.xpose.msrb.mxu0 %v2062_v38  ;;  %581 = vmatpush.xpose.msrb.mxu1 %v1518_v17  ;;  %v2065_v17 = vand.u32 4294901760, %v2064_v1 }
  0xab   : > { %723 = vmatpush.xpose.msrb.mxu3 %v722_v48 }
  0xac   : > { %622 = vmatpush.xpose.msrb.mxu2 %v1816_v56 }
  0xae   : > { %550 = vmatpush.xpose.msrb.mxu0 %v2063_v60  ;;  %583 = vmatpush.xpose.msrb.mxu1 %v1537_v47  ;;  %v2067_v47 = vld [vmem:[#allocation10_spill] sm:$0xff] }
  0xaf   : > { %729 = vmatpush.xpose.msrb.mxu3 %v728_v4  ;;  %v2068_v59 = vand.u32 4294901760, %v2067_v47 }
  0xb0   : > { %624 = vmatpush.xpose.msrb.mxu2 %v1834_v34 }
  0xb1   : > { %1021 = vmatmul.msk.f32.vlgmr.msrb.gmra.mxu0 %vm245_vm12, %v1212_v2 }
  0xb2   : > { %737 = vmatpush.xpose.msra.mxu0 %v2064_v1  ;;  %585 = vmatpush.xpose.msrb.mxu1 %v2066_v16 }
  0xb3   : > { %898 = vmatpush.xpose.msra.mxu3 %v1555_v10  ;;  %630 = vmatmul.f32.vlgmr.msrb.gmra.mxu2 %v629_v42 }
  0xb4   : > { %831 = vmatpush.xpose.msra.mxu2 %v2065_v17  ;;  %1023 = vmatmul.msk.f32.vlgmr.msrb.gmra.mxu3 %vm246_vm1, %v1212_v2 }
  0xb6   : > { %740 = vmatpush.xpose.msra.mxu0 %v2067_v47  ;;  %587 = vmatpush.xpose.msrb.mxu1 %v1584_v8 }
  0xb7   : > { %900 = vmatpush.xpose.msra.mxu3 %v1572_v49 }
  0xb8   : > { %835 = vmatpush.xpose.msra.mxu2 %v2068_v59 }
  0xb9   : > { %1022 = vmatmul.msk.f32.vlgmr.msrb.gmra.mxu1 %vm245_vm12, %v1212_v2 }
  0xba   : > { %743 = vmatpush.xpose.msra.mxu0 %v2069_v54  ;;  %790 = vmatpush.xpose.msra.mxu1 %v1555_v10  ;;  %v2072_v10 = vand.u32 4294901760, %v1683_v63 }
  0xbb   : > { %902 = vmatpush.xpose.msra.mxu3 %v1595_v5 }
  0xbc   : > { %839 = vmatpush.xpose.msra.mxu2 %v2070_v39 }
  0xbe   : > { %746 = vmatpush.xpose.msra.mxu0 %v1636_v12  ;;  %792 = vmatpush.xpose.msra.mxu1 %v1572_v49  ;;  %v2071_v49 = vand.u32 4294901760, %v1673_v29 }
  0xbf   : > { %904 = vmatpush.xpose.msra.mxu3 %v1619_v55 }
  0xc0   : > { %843 = vmatpush.xpose.msra.mxu2 %v654_v23 }
  0xc2   : > { %749 = vmatpush.xpose.msra.mxu0 %v1656_v28  ;;  %794 = vmatpush.xpose.msra.mxu1 %v1595_v5  ;;  %v2073_v5 = vand.u32 4294901760, %v1700_v24 }
  0xc3   : > { %906 = vmatpush.xpose.msra.mxu3 %v1638_v62 }
  0xc4   : > { %847 = vmatpush.xpose.msra.mxu2 %v660_v61 }
  0xc6   : > { %752 = vmatpush.xpose.msra.mxu0 %v1673_v29  ;;  %796 = vmatpush.xpose.msra.mxu1 %v1619_v55 }
  0xc7   : > { %908 = vmatpush.xpose.msra.mxu3 %v1658_v13 }
  0xc8   : > { %851 = vmatpush.xpose.msra.mxu2 %v2071_v49 }
  0xca   : > { %755 = vmatpush.xpose.msra.mxu0 %v1683_v63  ;;  %798 = vmatpush.xpose.msra.mxu1 %v1638_v62 }
  0xcb   : > { %910 = vmatpush.xpose.msra.mxu3 %v1666_v7 }
  0xcc   : > { %855 = vmatpush.xpose.msra.mxu2 %v2072_v10 }
  0xce   : > { %758 = vmatpush.xpose.msra.mxu0 %v1700_v24  ;;  %800 = vmatpush.xpose.msra.mxu1 %v1658_v13 }
  0xcf   : > { %912 = vmatpush.xpose.msra.mxu3 %v1685_v11 }
  0xd0   : > { %859 = vmatpush.xpose.msra.mxu2 %v2073_v5 }
  0xd2   : > { %761 = vmatpush.xpose.msra.mxu0 %v1722_v14  ;;  %802 = vmatpush.xpose.msra.mxu1 %v1666_v7 }
  0xd3   : > { %914 = vmatpush.xpose.msra.mxu3 %v1705_v9 }
  0xd4   : > { %863 = vmatpush.xpose.msra.mxu2 %v684_v50 }
  0xd6   : > { %764 = vmatpush.xpose.msra.mxu0 %v1741_v27  ;;  %804 = vmatpush.xpose.msra.mxu1 %v1685_v11 }
  0xd7   : > { %916 = vmatpush.xpose.msra.mxu3 %v1719_v25 }
  0xd8   : > { %867 = vmatpush.xpose.msra.mxu2 %v690_v37 }
  0xda   : > { %767 = vmatpush.xpose.msra.mxu0 %v1764_v35  ;;  %806 = vmatpush.xpose.msra.mxu1 %v1705_v9 }
  0xdb   : > { %918 = vmatpush.xpose.msra.mxu3 %v1748_v31 }
  0xdc   : > { %871 = vmatpush.xpose.msra.mxu2 %v696_v51 }
  0xde   : > { %770 = vmatpush.xpose.msra.mxu0 %v1777_v19  ;;  %808 = vmatpush.xpose.msra.mxu1 %v1719_v25 }
  0xdf   : > { %920 = vmatpush.xpose.msra.mxu3 %v1758_v32 }
  0xe0   : > { %875 = vmatpush.xpose.msra.mxu2 %v702_v44 }
  0xe2   : > { %773 = vmatpush.xpose.msra.mxu0 %v1794_v3  ;;  %810 = vmatpush.xpose.msra.mxu1 %v1748_v31  ;;  %v251_v31 = vld [vmem:[#allocation5] sm:$0xff] }
  0xe3   : > { %922 = vmatpush.xpose.msra.mxu3 %v1780_v43 }
  0xe4   : > { %879 = vmatpush.xpose.msra.mxu2 %v708_v26 }
  0xe6   : > { %776 = vmatpush.xpose.msra.mxu0 %v1814_v21  ;;  %812 = vmatpush.xpose.msra.mxu1 %v1758_v32 }
  0xe7   : > { %924 = vmatpush.xpose.msra.mxu3 %v1796_v33 }
  0xe8   : > { %883 = vmatpush.xpose.msra.mxu2 %v714_v46 }
  0xea   : > { %779 = vmatpush.xpose.msra.mxu0 %v1832_v22  ;;  %814 = vmatpush.xpose.msra.mxu1 %v1780_v43 }
  0xeb   : > { %926 = vmatpush.xpose.msra.mxu3 %v1816_v56 }
  0xec   : > { %887 = vmatpush.xpose.msra.mxu2 %v720_v20 }
  0xee   : > { %782 = vmatpush.xpose.msra.mxu0 %v1847_v15  ;;  %816 = vmatpush.xpose.msra.mxu1 %v1796_v33 }
  0xef   : > { %928 = vmatpush.xpose.msra.mxu3 %v1834_v34 }
  0xf0   : > { %891 = vmatpush.xpose.msra.mxu2 %v726_v30 }
  0xf1   : > { %785 = vmatmul.f32.vlgmr.msra.gmra.mxu0 %v1861_v40 }
  0xf2   : > { %818 = vmatpush.xpose.msra.mxu1 %v1816_v56  ;;  %1025 = vmatmul.msk.f32.vlgmr.msra.gmra.mxu3 %vm246_vm1, %v1212_v2 }
  0xf3   : > { %1024 = vmatmul.msk.f32.vlgmr.msra.gmra.mxu2 %vm246_vm1, %v1212_v2 }
  0xf6   : > { %820 = vmatpush.xpose.msra.mxu1 %v1834_v34 }
  0xf9   : > { %824 = vmatmul.f32.vlgmr.msra.gmra.mxu1 %v627_v41 }
 0x100   : > { %v391_v29 = vpop.f32.mrf.mxu1 }
 0x109   : > { %v290_v55 = vpop.f32.mrf.mxu0 }
 0x10a   : > { %v392_v8 = vadd.f32 %v391_v29, %v290_v55  ;;  %v445_v62 = vpop.f32.mrf.mxu2 }
 0x10b   : > { %v484_v23 = vpop.f32.mrf.mxu3 }
 0x10c   : > { %v446_v12 = vadd.f32 %v445_v62, %v392_v8 }
 0x10e   : > { %v485_v28 = vadd.f32 %v484_v23, %v446_v12 }
 0x12e   : > { %v553_v13 = vpop.f32.mrf.mxu0 }
 0x12f   : > { %v554_v7 = vadd.f32 %v553_v13, %v485_v28 }
 0x136   : > { %v590_v61 = vpop.f32.mrf.mxu1  ;;  %v631_v11 = vpop.f32.mrf.mxu2 }
 0x137   : > { %v591_v63 = vadd.f32 %v590_v61, %v554_v7  ;;  %v732_v35 = vpop.f32.mrf.mxu3 }
 0x139   : > { %v632_v6 = vadd.f32 %v631_v11, %v591_v63 }
 0x13b   : > { %v733_v9 = vadd.f32 %v732_v35, %v632_v6 }
 0x16e   : > { %v786_v24 = vpop.f32.mrf.mxu0 }
 0x16f   : > { %v787_v32 = vadd.f32 %v786_v24, %v733_v9 }
 0x175   : > { %v931_v27 = vpop.f32.mrf.mxu3 }
 0x176   : > { %v825_v25 = vpop.f32.mrf.mxu1  ;;  %v894_v14 = vpop.f32.mrf.mxu2 }
 0x177   : > { %v826_v58 = vadd.f32 %v825_v25, %v787_v32 }
 0x179   : > { %v895_v50 = vadd.f32 %v894_v14, %v826_v58 }
 0x17b   : > { %v932_v37 = vadd.f32 %v931_v27, %v895_v50 }
 0x17d   : > { %v934_v19 = vadd.f32 %v932_v37, %v251_v31 }
 0x17f   : > { %935 = vst [vmem:[#allocation5] sm:$0xff] %v934_v19 }
 0x180   : > { %1034 = dma.vmem_to_hbm [thread:$0]  (%p1042_p0), %s945_s5, 128, %s947_s14, [#allocation4]  }
 0x181   : > { %1183 = dma.done.wait (%p1042_p0), [#allocation4], 128  }
 0x182   : > { %1185 = vsyncadd (%p1042_p0), [#allocation4], 4294967168 }
 0x183 PF: > { %s15_s11 = sadd.s32 1, %s1208_s11   ;;  %s2074_s6 = smov %s1192_s7 }
 0x184   : > { %p12_p1 = scmp.ge.s32.totalorder %s15_s11, 6   ;;  %s2075_s7 = smov %s1196_s8 }
 0x185   : > { %s2076_s8 = smov %s1275_s18  ;;  %s2077_s9 = smov %s1204_s10 }
 0x186   : > { %s2078_s10 = smov %s2080_s13  ;;  %14 = sbr.rel (!%p12_p1) target bundleno = 5 (0x5), region = 67 }
 0x18b   :  { %960 = vsyncpa [#allocation3], 1 }
 0x18c   :  { %962 = vsyncpa [#allocation3 + $0x1], 1 }
 0x18d   :  { %963 = vsyncpa [#allocation4], 1 }
 0x18e   :  { %965 = vsyncpa [#allocation4 + $0x1], 1 }

</bundles_post_ra>
